<compile_context>
chip_gen: v7x
topology: tpu7x:2x2x1
jax: 0.10.0
libtpu: 0.0.40
codegen_flags: <defaults>
</compile_context>

<pallas_src>
import functools

import jax
import jax.numpy as jnp
from jax.experimental import pallas as pl
from jax.experimental.pallas import tpu as pltpu

LANE = 128
SUBLANE_BF16 = 16          # bf16 packs 16 rows per (8,128) f32-equivalent tile
VMEM_BUDGET = 32 << 20     # conservative per-core budget (v7x has 64 MiB)


def _round_up(x, m):
    return (x + m - 1) // m * m


def _round_down(x, m):
    return (x // m) * m


def _cdiv(a, b):
    return (a + b - 1) // b


def _block_spec(shape, index_map, buffer_count=None):
    """BlockSpec with optional pipeline depth; degrades gracefully if the
    running jax does not support pipeline_mode / pl.Buffered."""
    if buffer_count is not None and hasattr(pl, "Buffered"):
        try:
            return pl.BlockSpec(shape, index_map,
                                pipeline_mode=pl.Buffered(buffer_count))
        except TypeError:
            pass
    return pl.BlockSpec(shape, index_map)


def _mlp_kernel(*refs, num_linear):
    """Fused MLP forward for one batch tile.

    refs = (x_ref, w0, b0, w1, b1, ..., w_last, b_last, out_ref)
      x_ref  : [TILE_B, in_pad]      bf16  (new tile each grid step)
      w_i    : [in_pad_i, out_pad_i] bf16  (VMEM-resident, constant index_map)
      b_i    : [1, out_pad_i]        f32
      out_ref: [TILE_B, out_pad]     bf16
    """
    x_ref = refs[0]
    out_ref = refs[-1]
    param_refs = refs[1:-1]

    h = x_ref[...]                                   # bf16 activations
    for li in range(num_linear):
        w = param_refs[2 * li][...]                  # bf16 weights -> MXU
        b = param_refs[2 * li + 1][...]              # f32 bias, [1, out_pad]
        # MXU matmul with f32 accumulation; bias-add / ReLU in f32 (v5e has no
        # bf16 VPU path).  Layer loop is unrolled at trace time, so the bias
        # broadcast happens once per layer, not per grid step.
        acc = jnp.dot(h, w, preferred_element_type=jnp.float32) + b
        if li != num_linear - 1:
            h = jnp.maximum(acc, 0.0).astype(jnp.bfloat16)
        else:
            out_ref[...] = acc.astype(out_ref.dtype)


def pad_params(params):
    """One-time: zero-pad all feature dims to multiples of 128 and cast
    weights to bf16 (biases stay f32).  Hoisted out of the per-call path."""
    padded = []
    for w, b in params:
        fan_in, fan_out = w.shape
        ip, op = _round_up(fan_in, LANE), _round_up(fan_out, LANE)
        w_p = jnp.zeros((ip, op), jnp.bfloat16).at[:fan_in, :fan_out].set(
            w.astype(jnp.bfloat16))
        b_p = jnp.zeros((1, op), jnp.float32).at[:, :fan_out].set(
            b.reshape(1, -1).astype(jnp.float32))
        padded.append((w_p, b_p))
    return padded


@functools.partial(jax.jit, static_argnames=("input_dim", "num_servers"))
def fcq_forward(req_sequence, padded_params, *, input_dim, num_servers):
    """padded_params: output of pad_params().  Returns f32 logits [batch, num_servers]."""
    x = req_sequence.reshape(-1, input_dim)
    batch = x.shape[0]

    in_pad = _round_up(input_dim, LANE)
    out_pad = _round_up(num_servers, LANE)
    max_feat_pad = max([in_pad, out_pad] + [w.shape[1] for w, _ in padded_params])

    # ---- tile sizing from the real VMEM footprint -------------------------
    weight_bytes = sum(int(w.size) * w.dtype.itemsize + int(b.size) * b.dtype.itemsize
                       for w, b in padded_params)
    # per-row cost: x (<=3 bufs, bf16) + out (2 bufs, bf16) + f32 intermediates
    row_bytes = 3 * in_pad * 2 + 2 * out_pad * 2 + 2 * max_feat_pad * 4
    budget = VMEM_BUDGET - 2 * weight_bytes          # 2x = worst case (no Buffered(1))
    max_tile_b = max(SUBLANE_BF16,
                     min(4096, _round_down(max(budget, 0) // row_bytes, SUBLANE_BF16)))

    # Near-divisor tile (minimal end-of-batch padding); >=2 steps when the
    # batch is big enough so megacore sharding on v7x actually engages.
    num_steps = _cdiv(batch, max_tile_b)
    if batch >= 2 * SUBLANE_BF16:
        num_steps = max(num_steps, 2)
    tile_b = _round_up(_cdiv(batch, num_steps), SUBLANE_BF16)
    padded_batch = _round_up(batch, tile_b)
    num_steps = padded_batch // tile_b

    # ---- pad input (fuses under jit) --------------------------------------
    x_p = jnp.zeros((padded_batch, in_pad), jnp.bfloat16)
    x_p = x_p.at[:batch, :input_dim].set(x.astype(jnp.bfloat16))

    # ---- specs -------------------------------------------------------------
    x_buf_depth = 3 if num_steps >= 3 else None       # extra depth helps v5e
    in_specs = [_block_spec((tile_b, in_pad), lambda i: (i, 0),
                            buffer_count=x_buf_depth)]
    flat_params = []
    for w_p, b_p in padded_params:
        ip, op = w_p.shape
        flat_params += [w_p, b_p]
        # Constant index_map -> resident in VMEM; single-buffered (no refetch).
        in_specs.append(_block_spec((ip, op), lambda i: (0, 0), buffer_count=1))
        in_specs.append(_block_spec((1, op), lambda i: (0, 0), buffer_count=1))

    # ---- VMEM limit from the footprint ------------------------------------
    x_bufs = 3 if x_buf_depth else 2
    footprint = (2 * weight_bytes
                 + x_bufs * tile_b * in_pad * 2
                 + 2 * tile_b * out_pad * 2
                 + 2 * tile_b * max_feat_pad * 4)
    vmem_limit = max(8 << 20, min(int(footprint * 1.5) + (2 << 20), 48 << 20))

    num_linear = len(padded_params)
    kernel = functools.partial(_mlp_kernel, num_linear=num_linear)

    out_padded = pl.pallas_call(
        kernel,
        out_shape=jax.ShapeDtypeStruct((padded_batch, out_pad), jnp.bfloat16),
        grid=(num_steps,),
        in_specs=in_specs,
        out_specs=pl.BlockSpec((tile_b, out_pad), lambda i: (i, 0)),
        compiler_params=pltpu.CompilerParams(
            dimension_semantics=("parallel",),       # megacore sharding on v7x
            vmem_limit_bytes=vmem_limit,
        ),
    )(x_p, *flat_params)

    # Slice off padding; present f32 logits like the PyTorch module.
    return out_padded[:batch, :num_servers].astype(jnp.float32)


def init_params(key, input_dim, hidden_dim, num_hidden_layers, num_servers):
    """Deterministic synthetic init (shapes match FCQModel.__init__)."""
    dims = [input_dim] + [hidden_dim] * (num_hidden_layers + 1) + [num_servers]
    params = []
    for i in range(len(dims) - 1):
        fan_in, fan_out = dims[i], dims[i + 1]
        key, kw, kb = jax.random.split(key, 3)
        bound = 1.0 / jnp.sqrt(jnp.float32(fan_in))
        w = jax.random.uniform(kw, (fan_in, fan_out), jnp.float32, -bound, bound)
        b = jax.random.uniform(kb, (1, fan_out), jnp.float32, -bound, bound)
        params.append((w, b))
    return params


def reference_forward_f32(req_sequence, params, input_dim):
    """Pure-JAX f32 reference matching the PyTorch module's math exactly."""
    h = req_sequence.reshape(-1, input_dim)
    for i, (w, b) in enumerate(params):
        h = jnp.dot(h, w) + b.reshape(1, -1)
        if i != len(params) - 1:
            h = jnp.maximum(h, 0.0)
    return h


if __name__ == "__main__":
    # Small, module-consistent shapes.
    space_dim = 4
    num_servers = 3
    hidden_dim = 32
    num_hidden_layers = 2
    batch = 2
    input_dim = (num_servers + 1) * space_dim        # 16

    key = jax.random.PRNGKey(0)
    key, kx = jax.random.split(key)
    # req_sequence [batch, num_servers+1, space_dim]; forward views it as [-1, input_dim]
    req_sequence = jax.random.normal(
        kx, (batch, num_servers + 1, space_dim), jnp.float32)

    params = init_params(key, input_dim, hidden_dim, num_hidden_layers, num_servers)
    padded_params = pad_params(params)               # hoisted: pad/cast once

    logits = fcq_forward(req_sequence, padded_params,
                         input_dim=input_dim, num_servers=num_servers)
    logits = jax.block_until_ready(logits)

    # Validate against the true f32 (PyTorch-equivalent) math; tolerance covers
    # the kernel's bf16 operand / f32 accumulate recipe.
    ref = reference_forward_f32(req_sequence, params, input_dim)
    assert logits.shape == (batch, num_servers), logits.shape
    assert jnp.allclose(logits, ref, atol=3e-2, rtol=3e-2), (logits, ref)

    print("KERNEL_OK")
</pallas_src>

<mosaic_0001>
module attributes {stable_mosaic.version = 11 : i64} {
  func.func @_mlp_kernel(%arg0: i32, %arg1: memref<16x128xbf16, #tpu.memory_space<vmem>>, %arg2: memref<128x128xbf16, #tpu.memory_space<vmem>>, %arg3: memref<1x128xf32, #tpu.memory_space<vmem>>, %arg4: memref<128x128xbf16, #tpu.memory_space<vmem>>, %arg5: memref<1x128xf32, #tpu.memory_space<vmem>>, %arg6: memref<128x128xbf16, #tpu.memory_space<vmem>>, %arg7: memref<1x128xf32, #tpu.memory_space<vmem>>, %arg8: memref<128x128xbf16, #tpu.memory_space<vmem>>, %arg9: memref<1x128xf32, #tpu.memory_space<vmem>>, %arg10: memref<16x128xbf16, #tpu.memory_space<vmem>>) attributes {dimension_semantics = [#tpu.dimension_semantics<parallel>], iteration_bounds = array<i64: 1>, scalar_prefetch = 0 : i64, scratch_operands = 0 : i64, tpu.core_type = #tpu.core_type<tc>, window_params = [{transform_indices = @transform_0, window_bounds = array<i64: 16, 128>}, {pipeline_mode = #tpu.pipeline_mode<synchronous>, transform_indices = @transform_1, window_bounds = array<i64: 128, 128>}, {pipeline_mode = #tpu.pipeline_mode<synchronous>, transform_indices = @transform_2, window_bounds = array<i64: 1, 128>}, {pipeline_mode = #tpu.pipeline_mode<synchronous>, transform_indices = @transform_3, window_bounds = array<i64: 128, 128>}, {pipeline_mode = #tpu.pipeline_mode<synchronous>, transform_indices = @transform_4, window_bounds = array<i64: 1, 128>}, {pipeline_mode = #tpu.pipeline_mode<synchronous>, transform_indices = @transform_5, window_bounds = array<i64: 128, 128>}, {pipeline_mode = #tpu.pipeline_mode<synchronous>, transform_indices = @transform_6, window_bounds = array<i64: 1, 128>}, {pipeline_mode = #tpu.pipeline_mode<synchronous>, transform_indices = @transform_7, window_bounds = array<i64: 128, 128>}, {pipeline_mode = #tpu.pipeline_mode<synchronous>, transform_indices = @transform_8, window_bounds = array<i64: 1, 128>}, {transform_indices = @transform_9, window_bounds = array<i64: 16, 128>}]} {
    %c0 = arith.constant 0 : index
    %c0_0 = arith.constant 0 : index
    %0 = vector.load %arg1[%c0, %c0_0] : memref<16x128xbf16, #tpu.memory_space<vmem>>, vector<16x128xbf16>
    %c0_1 = arith.constant 0 : index
    %c0_2 = arith.constant 0 : index
    %1 = vector.load %arg2[%c0_1, %c0_2] : memref<128x128xbf16, #tpu.memory_space<vmem>>, vector<128x128xbf16>
    %c0_3 = arith.constant 0 : index
    %c0_4 = arith.constant 0 : index
    %2 = vector.load %arg3[%c0_3, %c0_4] : memref<1x128xf32, #tpu.memory_space<vmem>>, vector<1x128xf32>
    %cst = arith.constant dense<0.000000e+00> : vector<16x128xf32>
    %3 = tpu.matmul %0, %1, %cst {dimension_numbers = #tpu.dot_dimension_numbers<[1], [0], [0], [1], [0, 0, 1, 1], [], []>} : vector<16x128xbf16>, vector<128x128xbf16>, vector<16x128xf32> -> vector<16x128xf32>
    %4 = vector.broadcast %2 : vector<1x128xf32> to vector<16x128xf32>
    %5 = arith.addf %3, %4 : vector<16x128xf32>
    %cst_5 = arith.constant 0.000000e+00 : f32
    %6 = vector.broadcast %cst_5 : f32 to vector<16x128xf32>
    %7 = arith.maximumf %5, %6 : vector<16x128xf32>
    %8 = arith.truncf %7 : vector<16x128xf32> to vector<16x128xbf16>
    %c0_6 = arith.constant 0 : index
    %c0_7 = arith.constant 0 : index
    %9 = vector.load %arg4[%c0_6, %c0_7] : memref<128x128xbf16, #tpu.memory_space<vmem>>, vector<128x128xbf16>
    %c0_8 = arith.constant 0 : index
    %c0_9 = arith.constant 0 : index
    %10 = vector.load %arg5[%c0_8, %c0_9] : memref<1x128xf32, #tpu.memory_space<vmem>>, vector<1x128xf32>
    %cst_10 = arith.constant dense<0.000000e+00> : vector<16x128xf32>
    %11 = tpu.matmul %8, %9, %cst_10 {dimension_numbers = #tpu.dot_dimension_numbers<[1], [0], [0], [1], [0, 0, 1, 1], [], []>} : vector<16x128xbf16>, vector<128x128xbf16>, vector<16x128xf32> -> vector<16x128xf32>
    %12 = vector.broadcast %10 : vector<1x128xf32> to vector<16x128xf32>
    %13 = arith.addf %11, %12 : vector<16x128xf32>
    %cst_11 = arith.constant 0.000000e+00 : f32
    %14 = vector.broadcast %cst_11 : f32 to vector<16x128xf32>
    %15 = arith.maximumf %13, %14 : vector<16x128xf32>
    %16 = arith.truncf %15 : vector<16x128xf32> to vector<16x128xbf16>
    %c0_12 = arith.constant 0 : index
    %c0_13 = arith.constant 0 : index
    %17 = vector.load %arg6[%c0_12, %c0_13] : memref<128x128xbf16, #tpu.memory_space<vmem>>, vector<128x128xbf16>
    %c0_14 = arith.constant 0 : index
    %c0_15 = arith.constant 0 : index
    %18 = vector.load %arg7[%c0_14, %c0_15] : memref<1x128xf32, #tpu.memory_space<vmem>>, vector<1x128xf32>
    %cst_16 = arith.constant dense<0.000000e+00> : vector<16x128xf32>
    %19 = tpu.matmul %16, %17, %cst_16 {dimension_numbers = #tpu.dot_dimension_numbers<[1], [0], [0], [1], [0, 0, 1, 1], [], []>} : vector<16x128xbf16>, vector<128x128xbf16>, vector<16x128xf32> -> vector<16x128xf32>
    %20 = vector.broadcast %18 : vector<1x128xf32> to vector<16x128xf32>
    %21 = arith.addf %19, %20 : vector<16x128xf32>
    %cst_17 = arith.constant 0.000000e+00 : f32
    %22 = vector.broadcast %cst_17 : f32 to vector<16x128xf32>
    %23 = arith.maximumf %21, %22 : vector<16x128xf32>
    %24 = arith.truncf %23 : vector<16x128xf32> to vector<16x128xbf16>
    %c0_18 = arith.constant 0 : index
    %c0_19 = arith.constant 0 : index
    %25 = vector.load %arg8[%c0_18, %c0_19] : memref<128x128xbf16, #tpu.memory_space<vmem>>, vector<128x128xbf16>
    %c0_20 = arith.constant 0 : index
    %c0_21 = arith.constant 0 : index
    %26 = vector.load %arg9[%c0_20, %c0_21] : memref<1x128xf32, #tpu.memory_space<vmem>>, vector<1x128xf32>
    %cst_22 = arith.constant dense<0.000000e+00> : vector<16x128xf32>
    %27 = tpu.matmul %24, %25, %cst_22 {dimension_numbers = #tpu.dot_dimension_numbers<[1], [0], [0], [1], [0, 0, 1, 1], [], []>} : vector<16x128xbf16>, vector<128x128xbf16>, vector<16x128xf32> -> vector<16x128xf32>
    %28 = vector.broadcast %26 : vector<1x128xf32> to vector<16x128xf32>
    %29 = arith.addf %27, %28 : vector<16x128xf32>
    %30 = arith.truncf %29 : vector<16x128xf32> to vector<16x128xbf16>
    %c0_23 = arith.constant 0 : index
    %c0_24 = arith.constant 0 : index
    %31 = vector.load %arg10[%c0_23, %c0_24] : memref<16x128xbf16, #tpu.memory_space<vmem>>, vector<16x128xbf16>
    tpu.vector_store %arg10[%c0_23, %c0_24], %30 {strides = array<i32>} : memref<16x128xbf16, #tpu.memory_space<vmem>>, vector<16x128xbf16>,
    return
  }
  func.func @transform_0(%arg0: i32) -> (i32, i32) {
    %c0_i32 = arith.constant 0 : i32
    %c0_i32_0 = arith.constant 0 : i32
    return %arg0, %c0_i32 : i32, i32
  }
  func.func @transform_1(%arg0: i32) -> (i32, i32) {
    %c0_i32 = arith.constant 0 : i32
    %c0_i32_0 = arith.constant 0 : i32
    %c0_i32_1 = arith.constant 0 : i32
    return %c0_i32, %c0_i32_0 : i32, i32
  }
  func.func @transform_2(%arg0: i32) -> (i32, i32) {
    %c0_i32 = arith.constant 0 : i32
    %c0_i32_0 = arith.constant 0 : i32
    %c0_i32_1 = arith.constant 0 : i32
    return %c0_i32, %c0_i32_0 : i32, i32
  }
  func.func @transform_3(%arg0: i32) -> (i32, i32) {
    %c0_i32 = arith.constant 0 : i32
    %c0_i32_0 = arith.constant 0 : i32
    %c0_i32_1 = arith.constant 0 : i32
    return %c0_i32, %c0_i32_0 : i32, i32
  }
  func.func @transform_4(%arg0: i32) -> (i32, i32) {
    %c0_i32 = arith.constant 0 : i32
    %c0_i32_0 = arith.constant 0 : i32
    %c0_i32_1 = arith.constant 0 : i32
    return %c0_i32, %c0_i32_0 : i32, i32
  }
  func.func @transform_5(%arg0: i32) -> (i32, i32) {
    %c0_i32 = arith.constant 0 : i32
    %c0_i32_0 = arith.constant 0 : i32
    %c0_i32_1 = arith.constant 0 : i32
    return %c0_i32, %c0_i32_0 : i32, i32
  }
  func.func @transform_6(%arg0: i32) -> (i32, i32) {
    %c0_i32 = arith.constant 0 : i32
    %c0_i32_0 = arith.constant 0 : i32
    %c0_i32_1 = arith.constant 0 : i32
    return %c0_i32, %c0_i32_0 : i32, i32
  }
  func.func @transform_7(%arg0: i32) -> (i32, i32) {
    %c0_i32 = arith.constant 0 : i32
    %c0_i32_0 = arith.constant 0 : i32
    %c0_i32_1 = arith.constant 0 : i32
    return %c0_i32, %c0_i32_0 : i32, i32
  }
  func.func @transform_8(%arg0: i32) -> (i32, i32) {
    %c0_i32 = arith.constant 0 : i32
    %c0_i32_0 = arith.constant 0 : i32
    %c0_i32_1 = arith.constant 0 : i32
    return %c0_i32, %c0_i32_0 : i32, i32
  }
  func.func @transform_9(%arg0: i32) -> (i32, i32) {
    %c0_i32 = arith.constant 0 : i32
    %c0_i32_0 = arith.constant 0 : i32
    return %arg0, %c0_i32 : i32, i32
  }
}

</mosaic_0001>

<bundles_post_ra>
// kernel: fcq_forward.1
= control target key start
LH: loop header
LB: loop body
LE: loop exit
PB: predicated region body
PF: predicated region fallthrough
CT: control target
= control target key end

     0   :  { %14 = vsyncpa [#allocation3], 0  ;;  %s1057_s0 = inlined_call_operand.vmem [shape: bf16[16,128], index: 0, kind: input, shape index: {}]   ;;  %s1058_s1 = inlined_call_operand.hbm [shape: bf16[128,128], index: 1, kind: input, shape index: {}]   ;;  %s1059_s2 = inlined_call_operand.vmem [shape: f32[1,128], index: 2, kind: input, shape index: {}]   ;;  %s1060_s3 = inlined_call_operand.hbm [shape: bf16[128,128], index: 3, kind: input, shape index: {}]   ;;  %s1061_s4 = inlined_call_operand.vmem [shape: f32[1,128], index: 4, kind: input, shape index: {}]   ;;  %s1062_s5 = inlined_call_operand.hbm [shape: bf16[128,128], index: 5, kind: input, shape index: {}]   ;;  %s1063_s6 = inlined_call_operand.vmem [shape: f32[1,128], index: 6, kind: input, shape index: {}]   ;;  %s1064_s7 = inlined_call_operand.hbm [shape: bf16[128,128], index: 7, kind: input, shape index: {}]   ;;  %s1065_s8 = inlined_call_operand.vmem [shape: f32[1,128], index: 8, kind: input, shape index: {}]   ;;  %s1066_s9 = inlined_call_operand.vmem [shape: bf16[16,128], index: 9, kind: output, shape index: {}]  }
   0x1   :  { %15 = vsyncpa [#allocation5], 0 }
   0x2   :  { %16 = vsyncpa [#allocation8], 0  ;;  %s867_s30 = smov [#allocation4]   ;;  %s868_s11 = smov [#allocation2]  }
   0x3   :  { %s38_s10 = sshll.u32 %s867_s30, 4  ;;  %s24_s12 = sshll.u32 %s868_s11, 4  ;;  %s39_s10 = int_to_ptr.vmem [resolvable:$true] %s38_s10  ;;  %s925_s12 = int_to_ptr.vmem [resolvable:$true] %s24_s12 }
   0x4   :  { %s773_s15 = scalar_lea.hbm %s1060_s3, 1024 }
   0x5   :  { %p774_p0 = scmp.ne.s32.totalorder %s1060_s3, %s773_s15  ;;  %p777_p1 = scmp.lt.u32.totalorder %s773_s15, %s1060_s3 }
   0x7   :  { %p779_p2 = pnand %p777_p1, %p774_p0 }
   0x9   :  { %782 = shalt.err (!%p779_p2)
}
   0xa   :  { %s783_s20 = scalar_lea.vmem %s39_s10, 1024  ;;  %p788_p4 = scmp.lt.s32.totalorder %s39_s10, %s39_s10 }
   0xb   :  { %p784_p3 = scmp.ne.s32.totalorder %s39_s10, %s783_s20  ;;  %p789_p5 = scmp.lt.s32.totalorder %s783_s20, %s783_s20 }
   0xd   :  { %p790_p6 = por %p789_p5, %p788_p4 }
   0xf   :  { %p791_p7 = pnand %p790_p6, %p784_p3 }
  0x11   :  { %794 = shalt.err (!%p791_p7)
}
  0x12   :  { %s869_s21 = smov 64   ;;  %s870_s22 = smov 4  }
  0x13   :  { %44 = dma.hbm_to_vmem [thread:$0]  %s1060_s3, 1024, %s39_s10, [#allocation5], %s869_s21, %s869_s21, %s870_s22  }
  0x14   :  { %s795_s27 = scalar_lea.hbm %s1058_s1, 1024 }
  0x15   :  { %p796_p8 = scmp.ne.s32.totalorder %s1058_s1, %s795_s27  ;;  %p799_p9 = scmp.lt.u32.totalorder %s795_s27, %s1058_s1 }
  0x17   :  { %p801_p10 = pnand %p799_p9, %p796_p8 }
  0x19   :  { %804 = shalt.err (!%p801_p10)
}
  0x1a   :  { %s805_s13 = scalar_lea.vmem %s925_s12, 1024  ;;  %p810_p12 = scmp.lt.s32.totalorder %s925_s12, %s925_s12 }
  0x1b   :  { %p806_p11 = scmp.ne.s32.totalorder %s925_s12, %s805_s13  ;;  %p811_p13 = scmp.lt.s32.totalorder %s805_s13, %s805_s13 }
  0x1d   :  { %p812_p0 = por %p811_p13, %p810_p12 }
  0x1f   :  { %p813_p1 = pnand %p812_p0, %p806_p11 }
  0x21   :  { %816 = shalt.err (!%p813_p1)
}
  0x22   :  { %30 = dma.hbm_to_vmem [thread:$0]  %s1058_s1, 1024, %s925_s12, [#allocation3], %s869_s21, %s869_s21, %s870_s22  }
  0x23   :  { %s871_s14 = smov [#allocation6]   ;;  %s872_s16 = smov [#allocation7]  }
  0x24   :  { %s52_s15 = sshll.u32 %s871_s14, 4  ;;  %s66_s17 = sshll.u32 %s872_s16, 4  ;;  %s53_s15 = int_to_ptr.vmem [resolvable:$true] %s52_s15  ;;  %s962_s17 = int_to_ptr.vmem [resolvable:$true] %s66_s17 }
  0x25   :  { %s817_s20 = scalar_lea.hbm %s1062_s5, 1024 }
  0x26   :  { %p818_p2 = scmp.ne.s32.totalorder %s1062_s5, %s817_s20  ;;  %p821_p3 = scmp.lt.u32.totalorder %s817_s20, %s1062_s5 }
  0x28   :  { %p823_p4 = pnand %p821_p3, %p818_p2 }
  0x2a   :  { %826 = shalt.err (!%p823_p4)
}
  0x2b   :  { %s827_s1 = scalar_lea.vmem %s53_s15, 1024  ;;  %p832_p6 = scmp.lt.s32.totalorder %s53_s15, %s53_s15 }
  0x2c   :  { %p828_p5 = scmp.ne.s32.totalorder %s53_s15, %s827_s1  ;;  %p833_p7 = scmp.lt.s32.totalorder %s827_s1, %s827_s1 }
  0x2e   :  { %p834_p8 = por %p833_p7, %p832_p6 }
  0x30   :  { %p835_p9 = pnand %p834_p8, %p828_p5 }
  0x32   :  { %838 = shalt.err (!%p835_p9)
}
  0x33   :  { %58 = dma.hbm_to_vmem [thread:$0]  %s1062_s5, 1024, %s53_s15, [#allocation5], %s869_s21, %s869_s21, %s870_s22  }
  0x34   :  { %s839_s30 = scalar_lea.hbm %s1064_s7, 1024 }
  0x35   :  { %p840_p10 = scmp.ne.s32.totalorder %s1064_s7, %s839_s30  ;;  %p843_p11 = scmp.lt.u32.totalorder %s839_s30, %s1064_s7 }
  0x37   :  { %p845_p12 = pnand %p843_p11, %p840_p10 }
  0x39   :  { %848 = shalt.err (!%p845_p12)
}
  0x3a   :  { %s849_s14 = scalar_lea.vmem %s962_s17, 1024  ;;  %p854_p0 = scmp.lt.s32.totalorder %s962_s17, %s962_s17 }
  0x3b   :  { %p850_p13 = scmp.ne.s32.totalorder %s962_s17, %s849_s14  ;;  %p855_p1 = scmp.lt.s32.totalorder %s849_s14, %s849_s14 }
  0x3d   :  { %p856_p2 = por %p855_p1, %p854_p0 }
  0x3f   :  { %p857_p3 = pnand %p856_p2, %p850_p13 }
  0x41   :  { %860 = shalt.err (!%p857_p3)
}
  0x42   :  { %72 = dma.hbm_to_vmem [thread:$0]  %s1064_s7, 1024, %s962_s17, [#allocation8], %s869_s21, %s869_s21, %s870_s22  }
  0x43   :  { %861 = dma.done.wait [#allocation3], 1024  }
  0x44   :  { %862 = vsyncadd [#allocation3], 4294966272 }
  0x45   :  { %863 = dma.done.wait [#allocation5], 2048  }
  0x46   :  { %864 = vsyncadd [#allocation5], 4294965248 }
  0x47   :  { %865 = dma.done.wait [#allocation8], 1024  }
  0x48   :  { %866 = vsyncadd [#allocation8], 4294966272  ;;  %v873_v0 = vmov 0.0   ;;  %vm874_vm0 = vmmov 0   ;;  %v740_v1 = vld [vmem:[#allocation2] sm:$0xff]   ;;  %v741_v2 = vld [vmem:[#allocation2 + $0x8] sm:$0xff]  }
  0x49   :  { %652 = vmatprep.subr.bf16.mxu0 %v873_v0  ;;  %668 = vmatprep.mubr.msk.bf16.mxu0 %vm874_vm0, %v873_v0  ;;  %v742_v3 = vld [vmem:[#allocation2 + $0x10] sm:$0xff]   ;;  %v749_v4 = vld [vmem:[#allocation4] sm:$0xff]   ;;  %v743_v5 = vld [vmem:[#allocation2 + $0x18] sm:$0xff]  }
  0x4a   :  { %672 = vmatprep.subr.bf16.mxu1 %v873_v0  ;;  %688 = vmatprep.mubr.msk.bf16.mxu1 %vm874_vm0, %v873_v0  ;;  %v750_v6 = vld [vmem:[#allocation4 + $0x8] sm:$0xff]   ;;  %v744_v7 = vld [vmem:[#allocation2 + $0x20] sm:$0xff]   ;;  %v751_v8 = vld [vmem:[#allocation4 + $0x10] sm:$0xff]  }
  0x4b   :  { %653 = vmatpush3.bf16.msra.mxu0 %v740_v1  ;;  %673 = vmatpush3.bf16.msra.mxu1 %v749_v4  ;;  %v745_v9 = vld [vmem:[#allocation2 + $0x28] sm:$0xff]   ;;  %v752_v10 = vld [vmem:[#allocation4 + $0x18] sm:$0xff]   ;;  %v746_v11 = vld [vmem:[#allocation2 + $0x30] sm:$0xff]  }
  0x4c   :  { %654 = vmatprep.subr.bf16.mxu0 %v873_v0  ;;  %674 = vmatprep.subr.bf16.mxu1 %v873_v0  ;;  %v753_v12 = vld [vmem:[#allocation4 + $0x20] sm:$0xff]   ;;  %v747_v13 = vld [vmem:[#allocation2 + $0x38] sm:$0xff]   ;;  %v754_v14 = vld [vmem:[#allocation4 + $0x28] sm:$0xff]  }
  0x4d   :  { %v748_v15 = vld [vmem:[%s1057_s0] sm:$0xff]   ;;  %v755_v16 = vld [vmem:[#allocation4 + $0x30] sm:$0xff]   ;;  %v756_v17 = vld [vmem:[#allocation4 + $0x38] sm:$0xff]  }
  0x4e   :  { %v757_v18 = vld [vmem:[#allocation6] sm:$0xff]   ;;  %v758_v19 = vld [vmem:[#allocation6 + $0x8] sm:$0xff]   ;;  %v759_v20 = vld [vmem:[#allocation6 + $0x10] sm:$0xff]  }
  0x4f   :  { %655 = vmatpush3.bf16.msra.mxu0 %v741_v2  ;;  %675 = vmatpush3.bf16.msra.mxu1 %v750_v6  ;;  %v760_v21 = vld [vmem:[#allocation6 + $0x18] sm:$0xff]   ;;  %v761_v22 = vld [vmem:[#allocation6 + $0x20] sm:$0xff]   ;;  %v762_v23 = vld [vmem:[#allocation6 + $0x28] sm:$0xff]  }
  0x50   :  { %656 = vmatprep.subr.bf16.mxu0 %v873_v0  ;;  %676 = vmatprep.subr.bf16.mxu1 %v873_v0  ;;  %v570_v24 = vld [vmem:[%s1059_s2] ss:$0 sm:$0xff]  ;;  %v763_v34 = vld [vmem:[#allocation6 + $0x30] sm:$0xff]   ;;  %v764_v35 = vld [vmem:[#allocation6 + $0x38] sm:$0xff]  }
  0x51   :  { %v765_v36 = vld [vmem:[#allocation7] sm:$0xff]   ;;  %v766_v37 = vld [vmem:[#allocation7 + $0x8] sm:$0xff]   ;;  %v767_v38 = vld [vmem:[#allocation7 + $0x10] sm:$0xff]  }
  0x52   :  { %v768_v39 = vld [vmem:[#allocation7 + $0x18] sm:$0xff]   ;;  %v769_v40 = vld [vmem:[#allocation7 + $0x20] sm:$0xff]   ;;  %v770_v41 = vld [vmem:[#allocation7 + $0x28] sm:$0xff]  }
  0x53   :  { %657 = vmatpush3.bf16.msra.mxu0 %v742_v3  ;;  %677 = vmatpush3.bf16.msra.mxu1 %v751_v8  ;;  %v580_v42 = vld [vmem:[%s1061_s4] ss:$0 sm:$0xff]  ;;  %v771_v52 = vld [vmem:[#allocation7 + $0x30] sm:$0xff]   ;;  %v772_v53 = vld [vmem:[#allocation7 + $0x38] sm:$0xff]  }
  0x54   :  { %658 = vmatprep.subr.bf16.mxu0 %v873_v0  ;;  %678 = vmatprep.subr.bf16.mxu1 %v873_v0  ;;  %v589_v54 = vld [vmem:[%s1063_s6] ss:$0 sm:$0xff] }
  0x57   :  { %659 = vmatpush3.bf16.msra.mxu0 %v743_v5  ;;  %679 = vmatpush3.bf16.msra.mxu1 %v752_v10 }
  0x58   :  { %660 = vmatprep.subr.bf16.mxu0 %v873_v0  ;;  %680 = vmatprep.subr.bf16.mxu1 %v873_v0 }
  0x5b   :  { %661 = vmatpush3.bf16.msra.mxu0 %v744_v7  ;;  %681 = vmatpush3.bf16.msra.mxu1 %v753_v12 }
  0x5c   :  { %662 = vmatprep.subr.bf16.mxu0 %v873_v0  ;;  %682 = vmatprep.subr.bf16.mxu1 %v873_v0 }
  0x5f   :  { %663 = vmatpush3.bf16.msra.mxu0 %v745_v9  ;;  %683 = vmatpush3.bf16.msra.mxu1 %v754_v14 }
  0x60   :  { %664 = vmatprep.subr.bf16.mxu0 %v873_v0  ;;  %684 = vmatprep.subr.bf16.mxu1 %v873_v0 }
  0x63   :  { %665 = vmatpush3.bf16.msra.mxu0 %v746_v11  ;;  %685 = vmatpush3.bf16.msra.mxu1 %v755_v16 }
  0x64   :  { %666 = vmatprep.subr.bf16.mxu0 %v873_v0  ;;  %686 = vmatprep.subr.bf16.mxu1 %v873_v0 }
  0x67   :  { %667 = vmatpush3.bf16.msra.mxu0 %v747_v13  ;;  %687 = vmatpush3.bf16.msra.mxu1 %v756_v17 }
  0x68   :  { %692 = vmatprep.subr.bf16.mxu0 %v873_v0  ;;  %712 = vmatprep.subr.bf16.mxu1 %v873_v0 }
  0x6a   :  { %669 = vmatmul.mubr.bf16.vlgmr.msra.gmra.mrb[0].mxu0 %v748_v15 }
  0x6b   :  { %708 = vmatprep.mubr.msk.bf16.mxu0 %vm874_vm0, %v873_v0  ;;  %693 = vmatpush3.bf16.msra.mxu0 %v757_v18 }
  0x6c   :  { %694 = vmatprep.subr.bf16.mxu0 %v873_v0 }
  0x6f   :  { %695 = vmatpush3.bf16.msra.mxu0 %v758_v19 }
  0x70   :  { %696 = vmatprep.subr.bf16.mxu0 %v873_v0 }
  0x73   :  { %697 = vmatpush3.bf16.msra.mxu0 %v759_v20 }
  0x74   :  { %698 = vmatprep.subr.bf16.mxu0 %v873_v0 }
  0x77   :  { %699 = vmatpush3.bf16.msra.mxu0 %v760_v21 }
  0x78   :  { %700 = vmatprep.subr.bf16.mxu0 %v873_v0 }
  0x7b   :  { %701 = vmatpush3.bf16.msra.mxu0 %v761_v22 }
  0x7c   :  { %702 = vmatprep.subr.bf16.mxu0 %v873_v0 }
  0x7f   :  { %703 = vmatpush3.bf16.msra.mxu0 %v762_v23 }
  0x80   :  { %704 = vmatprep.subr.bf16.mxu0 %v873_v0 }
  0x83   :  { %705 = vmatpush3.bf16.msra.mxu0 %v763_v34 }
  0x84   :  { %706 = vmatprep.subr.bf16.mxu0 %v873_v0 }
  0x87   :  { %707 = vmatpush3.bf16.msra.mxu0 %v764_v35 }
 0x13d   :  { %v201_v25 = vpop.f32.mrb[0].mxu0 }
 0x13e   :  { %v202_v26 = vadd.f32 %v570_v24, %v201_v25  ;;  %v670_v27 = vpop.f32.mrb[1].mxu0 }
 0x13f   :  { %v204_v28 = vpop.f32.mrb[2].mxu0 }
 0x140   :  { %v205_v29 = vadd.f32 %v570_v24, %v204_v28  ;;  %v671_v30 = vpop.f32.mrb[3].mxu0  ;;  %v208_v31 = vmax.f32 %v202_v26, 0.0 }
 0x142   :  { %v209_v32 = vmax.f32 %v205_v29, 0.0 }
 0x144   :  { %v210_v33 = vpack.c.bf16 %v209_v32, %v208_v31 }
 0x146   :  { %689 = vmatmul.mubr.bf16.vlgmr.msra.gmra.mrb[0].mxu1 %v210_v33 }
 0x147   :  { %728 = vmatprep.mubr.msk.bf16.mxu1 %vm874_vm0, %v873_v0  ;;  %713 = vmatpush3.bf16.msra.mxu1 %v765_v36 }
 0x148   :  { %714 = vmatprep.subr.bf16.mxu1 %v873_v0 }
 0x14b   :  { %715 = vmatpush3.bf16.msra.mxu1 %v766_v37 }
 0x14c   :  { %716 = vmatprep.subr.bf16.mxu1 %v873_v0 }
 0x14f   :  { %717 = vmatpush3.bf16.msra.mxu1 %v767_v38 }
 0x150   :  { %718 = vmatprep.subr.bf16.mxu1 %v873_v0 }
 0x153   :  { %719 = vmatpush3.bf16.msra.mxu1 %v768_v39 }
 0x154   :  { %720 = vmatprep.subr.bf16.mxu1 %v873_v0 }
 0x157   :  { %721 = vmatpush3.bf16.msra.mxu1 %v769_v40 }
 0x158   :  { %722 = vmatprep.subr.bf16.mxu1 %v873_v0 }
 0x15b   :  { %723 = vmatpush3.bf16.msra.mxu1 %v770_v41 }
 0x15c   :  { %724 = vmatprep.subr.bf16.mxu1 %v873_v0 }
 0x15f   :  { %725 = vmatpush3.bf16.msra.mxu1 %v771_v52 }
 0x160   :  { %726 = vmatprep.subr.bf16.mxu1 %v873_v0  ;;  %v598_v0 = vld [vmem:[%s1065_s8] ss:$0 sm:$0xff] }
 0x163   :  { %727 = vmatpush3.bf16.msra.mxu1 %v772_v53 }
 0x219   :  { %v316_v43 = vpop.f32.mrb[0].mxu1 }
 0x21a   :  { %v317_v44 = vadd.f32 %v580_v42, %v316_v43  ;;  %v690_v45 = vpop.f32.mrb[1].mxu1 }
 0x21b   :  { %v319_v46 = vpop.f32.mrb[2].mxu1 }
 0x21c   :  { %v320_v47 = vadd.f32 %v580_v42, %v319_v46  ;;  %v691_v48 = vpop.f32.mrb[3].mxu1  ;;  %v323_v49 = vmax.f32 %v317_v44, 0.0 }
 0x21e   :  { %v324_v50 = vmax.f32 %v320_v47, 0.0 }
 0x220   :  { %v325_v51 = vpack.c.bf16 %v324_v50, %v323_v49 }
 0x222   :  { %709 = vmatmul.mubr.bf16.vlgmr.msra.gmra.mrb[4].mxu0 %v325_v51 }
 0x2f5   :  { %v431_v55 = vpop.f32.mrb[4].mxu0 }
 0x2f6   :  { %v432_v56 = vadd.f32 %v589_v54, %v431_v55  ;;  %v710_v57 = vpop.f32.mrb[5].mxu0 }
 0x2f7   :  { %v434_v58 = vpop.f32.mrb[6].mxu0 }
 0x2f8   :  { %v435_v59 = vadd.f32 %v589_v54, %v434_v58  ;;  %v711_v60 = vpop.f32.mrb[7].mxu0  ;;  %v438_v61 = vmax.f32 %v432_v56, 0.0 }
 0x2fa   :  { %v439_v62 = vmax.f32 %v435_v59, 0.0 }
 0x2fc   :  { %v440_v63 = vpack.c.bf16 %v439_v62, %v438_v61 }
 0x2fe   :  { %729 = vmatmul.mubr.bf16.vlgmr.msra.gmra.mrb[4].mxu1 %v440_v63 }
 0x3d1   :  { %v546_v1 = vpop.f32.mrb[4].mxu1 }
 0x3d2   :  { %v730_v2 = vpop.f32.mrb[5].mxu1  ;;  %v547_v4 = vadd.f32 %v598_v0, %v546_v1 }
 0x3d3   :  { %v549_v3 = vpop.f32.mrb[6].mxu1 }
 0x3d4   :  { %v550_v5 = vadd.f32 %v598_v0, %v549_v3  ;;  %v731_v6 = vpop.f32.mrb[7].mxu1 }
 0x3d6   :  { %v614_v7 = vpack.c.bf16 %v550_v5, %v547_v4 }
 0x3d8   :  { %615 = vst [vmem:[%s1066_s9] sm:$0xff] %v614_v7  }
 0x3d9   :  { %567 = vsyncpa [#allocation3], 1 }
 0x3da   :  { %568 = vsyncpa [#allocation5], 1 }
 0x3db   :  { %569 = vsyncpa [#allocation8], 1 }

</bundles_post_ra>
